<compile_context>
chip_gen: v7x
topology: tpu7x:2x2x1
jax: 0.10.0
libtpu: 0.0.40
codegen_flags: <defaults>
</compile_context>

<pallas_src>
import numpy as np
import jax
import jax.numpy as jnp
from jax import lax
from jax.experimental import pallas as pl
from jax.experimental.pallas import tpu as pltpu

COEFF_DIM = 257   # Deep3DFaceRecon coefficient dim (ResNet50, use_last_fc=False)
ID_DIM = 512      # arcface iresnet100 embedding dim
ID_SIZE = 112     # arcface input resolution

_SINGLE_SHOT_WEIGHT_BYTES = 2 << 20   # <= 2 MiB padded bf16 weight -> one grid point


# ------------------------------- helpers ----------------------------------

def _round_up(x, m):
    return (x + m - 1) // m * m


def _vmem_capacity_bytes():
    """Physical VMEM of the attached TPU; conservative (v7x, 64 MiB) fallback."""
    try:
        cap = getattr(pltpu.get_tpu_info(), "vmem_capacity_bytes", None)
        if cap:
            return int(cap)
    except Exception:
        pass
    return 64 << 20


def _choose_tile_k(k_pad, n_pad, w_budget_bytes):
    """Largest multiple-of-128 K tile whose double-buffered bf16 weight block
    (2 buffers * tk * n_pad * 2 bytes) fits w_budget_bytes."""
    max_tk = max(128, (w_budget_bytes // (2 * 2 * n_pad)) // 128 * 128)
    if k_pad <= max_tk:
        return k_pad, k_pad
    for cand in range(max_tk, 127, -128):
        if k_pad % cand == 0:
            return cand, k_pad
    # No aligned divisor: pad K with zeros. Numerically correct (zero-fill),
    # but streams extra weight bytes — revisit if shapes ever hit this path.
    return max_tk, _round_up(k_pad, max_tk)


# --------------------------- fused linear head ------------------------------

def fused_linear(x, w, b, *, normalize=False):
    """y = x @ w + b (optionally L2-normalized along dim -1, fused in-kernel).

    Weights/activations stream as bf16, accumulation is f32 on the MXU.
    Small heads (padded weight <= 2 MiB) run as a single grid point with no
    accumulator; large heads stream the weight over a 1-D K grid with the
    full-width output resident, bias-add and F.normalize folded into the
    last-K epilogue (removes a separate normalize launch + HBM round trip).
    """
    M, K = x.shape
    Kw, N = w.shape
    assert K == Kw
    n_pad = _round_up(N, 128)
    k_pad = _round_up(K, 128)

    xb = x.astype(jnp.bfloat16)
    wb = w.astype(jnp.bfloat16)
    bb = b.astype(jnp.float32)
    if n_pad != N:
        wb = jnp.pad(wb, ((0, 0), (0, n_pad - N)))
        bb = jnp.pad(bb, (0, n_pad - N))
    b2 = bb.reshape(1, n_pad)

    # ---- small head: one grid point, no accumulator, no program_id ---------
    if k_pad * n_pad * 2 <= _SINGLE_SHOT_WEIGHT_BYTES:
        if k_pad != K:
            xb = jnp.pad(xb, ((0, 0), (0, k_pad - K)))
            wb = jnp.pad(wb, ((0, k_pad - K), (0, 0)))

        def small_kernel(x_ref, w_ref, b_ref, o_ref):
            z = jnp.dot(x_ref[...], w_ref[...],
                        preferred_element_type=jnp.float32) + b_ref[...]
            if normalize:
                norm = jnp.sqrt(jnp.sum(z * z, axis=-1, keepdims=True))
                z = z / jnp.maximum(norm, 1e-12)
            o_ref[...] = z

        out = pl.pallas_call(
            small_kernel,
            out_shape=jax.ShapeDtypeStruct((M, n_pad), jnp.float32),
            in_specs=[pl.BlockSpec(memory_space=pltpu.MemorySpace.VMEM)] * 3,
            out_specs=pl.BlockSpec(memory_space=pltpu.MemorySpace.VMEM),
        )(xb, wb, b2)
        return out[:, :N] if n_pad != N else out

    # ---- large head: stream weight over K, everything else resident --------
    cap = _vmem_capacity_bytes()
    w_budget = (40 << 20) if cap >= (100 << 20) else (26 << 20)
    tk, k_pad = _choose_tile_k(k_pad, n_pad, w_budget)
    if k_pad != K:
        xb = jnp.pad(xb, ((0, 0), (0, k_pad - K)))
        wb = jnp.pad(wb, ((0, k_pad - K), (0, 0)))
    nk = k_pad // tk

    def stream_kernel(x_ref, w_ref, b_ref, o_ref, acc_ref):
        # Grid queries ONLY at the top level (never inside pl.when bodies).
        k_idx = pl.program_id(0)
        is_first = k_idx == 0
        is_last = k_idx == pl.num_programs(0) - 1

        @pl.when(is_first)
        def _():
            acc_ref[...] = jnp.zeros_like(acc_ref)

        acc_ref[...] += jnp.dot(x_ref[...], w_ref[...],
                                preferred_element_type=jnp.float32)

        @pl.when(is_last)
        def _():
            z = acc_ref[...] + b_ref[...]
            if normalize:
                # Zero-padded output columns contribute 0 to the norm.
                norm = jnp.sqrt(jnp.sum(z * z, axis=-1, keepdims=True))
                z = z / jnp.maximum(norm, 1e-12)     # F.normalize(p=2, dim=-1)
            o_ref[...] = z

    # Double-buffered bf16 streams + resident f32 bias / output / accumulator.
    footprint = (2 * (tk * n_pad + M * tk) * 2
                 + 2 * (n_pad * 4 + M * n_pad * 4)
                 + M * n_pad * 4)
    vmem_limit = int(max(16 << 20, min(cap - (8 << 20), footprint + (8 << 20))))

    out = pl.pallas_call(
        stream_kernel,
        out_shape=jax.ShapeDtypeStruct((M, n_pad), jnp.float32),
        grid=(nk,),
        in_specs=[
            pl.BlockSpec((M, tk), lambda k: (0, k)),        # activations
            pl.BlockSpec((tk, n_pad), lambda k: (k, 0)),    # streamed weight
            pl.BlockSpec((1, n_pad), lambda k: (0, 0)),     # resident bias
        ],
        out_specs=pl.BlockSpec((M, n_pad), lambda k: (0, 0)),
        scratch_shapes=[pltpu.VMEM((M, n_pad), jnp.float32)],
        compiler_params=pltpu.CompilerParams(
            dimension_semantics=("arbitrary",),
            vmem_limit_bytes=vmem_limit,
        ),
    )(xb, wb, b2)
    return out[:, :N] if n_pad != N else out


# ---------------- fused preprocess + separable bicubic resize ---------------

def _cubic_weight(t, a=-0.75):
    t = np.abs(t)
    return np.where(
        t <= 1.0, (a + 2) * t ** 3 - (a + 3) * t ** 2 + 1.0,
        np.where(t < 2.0, a * t ** 3 - 5 * a * t ** 2 + 8 * a * t - 4 * a, 0.0))


def bicubic_matrix(in_size, out_size):
    """Row-interp matrix matching F.interpolate(mode='bicubic', align_corners=False)."""
    scale = in_size / out_size
    A = np.zeros((out_size, in_size), dtype=np.float64)
    for o in range(out_size):
        src = (o + 0.5) * scale - 0.5
        f = int(np.floor(src))
        frac = src - f
        for k in range(-1, 3):
            w = _cubic_weight(k - frac)
            idx = min(max(f + k, 0), in_size - 1)   # replicate border
            A[o, idx] += w
    return jnp.asarray(A, dtype=jnp.float32)


def pallas_resize_norm(x, out_size):
    """(B,C,H,W) in [0,1] -> (B*C, out, out) bf16 of Ah @ ((x-0.5)/0.5) @ Aw^T.

    Single grid point: all B*C planes are resized in one kernel invocation
    (inputs/outputs total < 200 KB), with the arcface preprocessing fused in
    and the output emitted in bf16 exactly as the id head consumes it.
    """
    B, C, H, W = x.shape
    P = B * C
    ah = bicubic_matrix(H, out_size)              # (out, H)
    awt = bicubic_matrix(W, out_size).T           # (W, out)
    planes = x.reshape(P, H, W)

    def kernel(ah_ref, awt_ref, x_ref, o_ref):
        for p in range(P):                        # static unroll over planes
            xp = x_ref[p] * 2.0 - 1.0             # == (x - 0.5) / 0.5
            y = jnp.dot(ah_ref[...], xp, preferred_element_type=jnp.float32)
            y = jnp.dot(y, awt_ref[...], preferred_element_type=jnp.float32)
            o_ref[p] = y.astype(o_ref.dtype)

    return pl.pallas_call(
        kernel,
        out_shape=jax.ShapeDtypeStruct((P, out_size, out_size), jnp.bfloat16),
        in_specs=[pl.BlockSpec(memory_space=pltpu.MemorySpace.VMEM)] * 3,
        out_specs=pl.BlockSpec(memory_space=pltpu.MemorySpace.VMEM),
    )(ah, awt, planes)


# ------------------------------ full forward ------------------------------

def init_params(key, H, W):
    k1, k2, k3 = jax.random.split(key, 3)
    k3d = 3 * H * W
    kid = 3 * ID_SIZE * ID_SIZE
    return {
        # Weights stored bf16 (streamed as-is from HBM); biases in f32.
        "w3d": (jax.random.normal(k1, (k3d, COEFF_DIM), jnp.float32)
                / np.sqrt(k3d)).astype(jnp.bfloat16),
        "b3d": 0.01 * jax.random.normal(k2, (COEFF_DIM,), jnp.float32),
        "wid": (jax.random.normal(k3, (kid, ID_DIM), jnp.float32)
                / np.sqrt(kid)).astype(jnp.bfloat16),
        "bid": jnp.zeros((ID_DIM,), jnp.float32),
    }


def shape_aware_identity_extractor(params, i_source, i_target):
    B, C, H, W = i_source.shape

    # f_3d coefficient head: ONE pass over w3d for both images (rows stacked);
    # the torch.cat((c_s[:, :80], c_t[:, 80:])) is applied on the tiny result.
    # TODO(synk): pretrained ReconNetWrapper(ResNet50) backbone not reimplemented;
    #             replaced by a deterministic linear head with the same output dim.
    x_stack = jnp.concatenate(
        [i_source.reshape(B, -1), i_target.reshape(B, -1)], axis=0)
    c = fused_linear(x_stack, params["w3d"], params["b3d"])           # (2B, 257)
    c_fuse = jnp.concatenate([c[:B, :80], c[B:, 80:]], axis=1)        # (B, 257)

    # f_id path: fused (x-0.5)/0.5 + bicubic resize to 112, then the embedding
    # head with F.normalize fused into its last-K epilogue.
    # TODO(synk): pretrained iresnet100 (arcface) backbone not reimplemented;
    #             replaced by a deterministic linear head with the same output dim.
    x112 = pallas_resize_norm(i_source, ID_SIZE).reshape(B, -1)       # (B, 37632) bf16
    v_id = fused_linear(x112, params["wid"], params["bid"], normalize=True)  # (B, 512)

    return jnp.concatenate([c_fuse, v_id], axis=1)                    # (B, 769)


def reference(params, i_source, i_target):
    """Pure-JAX reference (same bf16 storage, f32 compute) for verification."""
    B, C, H, W = i_source.shape
    hp = lax.Precision.HIGHEST
    w3d = params["w3d"].astype(jnp.float32)
    wid = params["wid"].astype(jnp.float32)
    xs = i_source.reshape(B, -1).astype(jnp.bfloat16).astype(jnp.float32)
    xt = i_target.reshape(B, -1).astype(jnp.bfloat16).astype(jnp.float32)
    c_s = jnp.dot(xs, w3d, precision=hp) + params["b3d"]
    c_t = jnp.dot(xt, w3d, precision=hp) + params["b3d"]
    c_fuse = jnp.concatenate([c_s[:, :80], c_t[:, 80:]], axis=1)
    xn = (i_source - 0.5) / 0.5
    Ah = bicubic_matrix(H, ID_SIZE)
    Aw = bicubic_matrix(W, ID_SIZE)
    y = jnp.einsum("oh,bchw->bcow", Ah, xn, precision=hp)
    y = jnp.einsum("pw,bcow->bcop", Aw, y, precision=hp)
    y = y.astype(jnp.bfloat16).astype(jnp.float32)   # id-head activations are bf16
    v_raw = jnp.dot(y.reshape(B, -1), wid, precision=hp) + params["bid"]
    norm = jnp.sqrt(jnp.sum(v_raw * v_raw, axis=-1, keepdims=True))
    v_id = v_raw / jnp.maximum(norm, 1e-12)
    return jnp.concatenate([c_fuse, v_id], axis=1)


if __name__ == "__main__":
    B, C, H, W = 2, 3, 16, 16
    key = jax.random.PRNGKey(0)
    kp, ks, kt = jax.random.split(key, 3)
    params = init_params(kp, H, W)
    i_source = jax.random.uniform(ks, (B, C, H, W), jnp.float32)   # images in [0, 1]
    i_target = jax.random.uniform(kt, (B, C, H, W), jnp.float32)

    v_sid = shape_aware_identity_extractor(params, i_source, i_target)
    v_sid = jax.block_until_ready(v_sid)

    assert v_sid.shape == (B, COEFF_DIM + ID_DIM), v_sid.shape
    assert bool(jnp.all(jnp.isfinite(v_sid)))
    v_ref = reference(params, i_source, i_target)
    np.testing.assert_allclose(np.asarray(v_sid), np.asarray(v_ref),
                               rtol=2e-3, atol=2e-3)
    print("KERNEL_OK")
</pallas_src>

<mosaic_0001>
module attributes {stable_mosaic.version = 11 : i64} {
  func.func @small_kernel(%arg0: memref<4x768xbf16, #tpu.memory_space<vmem>>, %arg1: memref<768x384xbf16, #tpu.memory_space<vmem>>, %arg2: memref<1x384xf32, #tpu.memory_space<vmem>>, %arg3: memref<4x384xf32, #tpu.memory_space<vmem>>) attributes {dimension_semantics = [], scalar_prefetch = 0 : i64, scratch_operands = 0 : i64, tpu.core_type = #tpu.core_type<tc>} {
    %c0 = arith.constant 0 : index
    %c0_0 = arith.constant 0 : index
    %0 = vector.load %arg0[%c0, %c0_0] : memref<4x768xbf16, #tpu.memory_space<vmem>>, vector<4x768xbf16>
    %c0_1 = arith.constant 0 : index
    %c0_2 = arith.constant 0 : index
    %1 = vector.load %arg1[%c0_1, %c0_2] : memref<768x384xbf16, #tpu.memory_space<vmem>>, vector<768x384xbf16>
    %cst = arith.constant dense<0.000000e+00> : vector<4x384xf32>
    %2 = tpu.matmul %0, %1, %cst {dimension_numbers = #tpu.dot_dimension_numbers<[1], [0], [0], [1], [0, 0, 1, 1], [], []>} : vector<4x768xbf16>, vector<768x384xbf16>, vector<4x384xf32> -> vector<4x384xf32>
    %c0_3 = arith.constant 0 : index
    %c0_4 = arith.constant 0 : index
    %3 = vector.load %arg2[%c0_3, %c0_4] : memref<1x384xf32, #tpu.memory_space<vmem>>, vector<1x384xf32>
    %4 = vector.broadcast %3 : vector<1x384xf32> to vector<4x384xf32>
    %5 = arith.addf %2, %4 : vector<4x384xf32>
    %c0_5 = arith.constant 0 : index
    %c0_6 = arith.constant 0 : index
    %6 = vector.load %arg3[%c0_5, %c0_6] : memref<4x384xf32, #tpu.memory_space<vmem>>, vector<4x384xf32>
    tpu.vector_store %arg3[%c0_5, %c0_6], %5 {strides = array<i32>} : memref<4x384xf32, #tpu.memory_space<vmem>>, vector<4x384xf32>,
    return
  }
}

</mosaic_0001>

<bundles_post_ra>
// kernel: tpu_custom_call.1
= control target key start
LH: loop header
LB: loop body
LE: loop exit
PB: predicated region body
PF: predicated region fallthrough
CT: control target
= control target key end

     0   :  { %8 = vsyncpa [#allocation3], 0  ;;  %s1913_s0 = inlined_call_operand.hbm [shape: bf16[4,768], index: 0, kind: input, shape index: {}]   ;;  %s1914_s1 = inlined_call_operand.hbm [shape: bf16[768,384], index: 1, kind: input, shape index: {}]   ;;  %s1915_s2 = inlined_call_operand.vmem [shape: f32[1,384], index: 2, kind: input, shape index: {}]   ;;  %s1916_s3 = inlined_call_operand.hbm [shape: f32[4,384], index: 3, kind: output, shape index: {}]  }
   0x1   :  { %9 = vsyncpa [#allocation6], 0 }
   0x2   :  { %10 = vsyncpa [#allocation4], 0  ;;  %s1809_s12 = smov [#allocation2]   ;;  %s1810_s14 = smov [#allocation5]  }
   0x3   :  { %s17_s13 = sshll.u32 %s1809_s12, 4  ;;  %s26_s15 = sshll.u32 %s1810_s14, 4  ;;  %s18_s13 = int_to_ptr.vmem [resolvable:$true] %s17_s13  ;;  %s1835_s15 = int_to_ptr.vmem [resolvable:$true] %s26_s15 }
   0x4   :  { %s1737_s18 = scalar_lea.hbm %s1913_s0, 192 }
   0x5   :  { %p1738_p0 = scmp.ne.s32.totalorder %s1913_s0, %s1737_s18  ;;  %p1741_p1 = scmp.lt.u32.totalorder %s1737_s18, %s1913_s0 }
   0x7   :  { %p1743_p2 = pnand %p1741_p1, %p1738_p0 }
   0x9   :  { %1746 = shalt.err (!%p1743_p2)
}
   0xa   :  { %s1747_s23 = scalar_lea.vmem %s18_s13, 192  ;;  %p1752_p4 = scmp.lt.s32.totalorder %s18_s13, %s18_s13 }
   0xb   :  { %p1748_p3 = scmp.ne.s32.totalorder %s18_s13, %s1747_s23  ;;  %p1753_p5 = scmp.lt.s32.totalorder %s1747_s23, %s1747_s23 }
   0xd   :  { %p1754_p6 = por %p1753_p5, %p1752_p4 }
   0xf   :  { %p1755_p7 = pnand %p1754_p6, %p1748_p3 }
  0x11   :  { %1758 = shalt.err (!%p1755_p7)
}
  0x12   :  { %20 = dma.hbm_to_vmem [thread:$0]  %s1913_s0, 192, %s18_s13, [#allocation3]  }
  0x13   :  { %s1759_s28 = scalar_lea.hbm %s1914_s1, 18432 }
  0x14   :  { %p1760_p8 = scmp.ne.s32.totalorder %s1914_s1, %s1759_s28  ;;  %p1763_p9 = scmp.lt.u32.totalorder %s1759_s28, %s1914_s1 }
  0x16   :  { %p1765_p10 = pnand %p1763_p9, %p1760_p8 }
  0x18   :  { %1768 = shalt.err (!%p1765_p10)
}
  0x19   :  { %s1769_s6 = scalar_lea.vmem %s1835_s15, 18432  ;;  %p1774_p12 = scmp.lt.s32.totalorder %s1835_s15, %s1835_s15 }
  0x1a   :  { %p1770_p11 = scmp.ne.s32.totalorder %s1835_s15, %s1769_s6  ;;  %p1775_p13 = scmp.lt.s32.totalorder %s1769_s6, %s1769_s6 }
  0x1c   :  { %p1776_p0 = por %p1775_p13, %p1774_p12 }
  0x1e   :  { %p1777_p1 = pnand %p1776_p0, %p1770_p11 }
  0x20   :  { %1780 = shalt.err (!%p1777_p1)
}
  0x21   :  { %s1811_s0 = smov 192   ;;  %s1812_s7 = smov 12  }
  0x22   :  { %32 = dma.hbm_to_vmem [thread:$0]  %s1914_s1, 18432, %s1835_s15, [#allocation6], %s1811_s0, %s1811_s0, %s1812_s7  }
  0x23   :  { %1803 = dma.done.wait [#allocation3], 192  }
  0x24   :  { %1804 = vsyncadd [#allocation3], 4294967104 }
  0x25   :  { %1805 = dma.done.wait [#allocation6], 18432  }
  0x26   :  { %1806 = vsyncadd [#allocation6], 4294948864  ;;  %v1544_v0 = vld [vmem:[#allocation5 + $0x4] ss:$12 sps:$4 sm:$0xff]   ;;  %v1548_v2 = vld [vmem:[#allocation5] ss:$12 sps:$4 sm:$0xff]   ;;  %v238_v36 = vlaneseq }
  0x27   :  { %v1546_v1 = vld [vmem:[#allocation5 + $0x184] ss:$12 sps:$4 sm:$0xff]   ;;  %1054 = vmatprep.subr.bf16.mxu1 %v1544_v0  ;;  %v1549_v3 = vld [vmem:[#allocation5 + $0x180] ss:$12 sps:$4 sm:$0xff]   ;;  %v1550_v4 = vld [vmem:[#allocation5 + $0x1c] ss:$12 sps:$4 sm:$0xff]  }
  0x28   :  { %1095 = vmatprep.subr.bf16.mxu0 %v1546_v1  ;;  %1055 = vmatpush1.bf16.msra.mxu1 %v1548_v2  ;;  %v1552_v5 = vld [vmem:[#allocation5 + $0x19c] ss:$12 sps:$4 sm:$0xff]   ;;  %v1554_v6 = vld [vmem:[#allocation5 + $0x18] ss:$12 sps:$4 sm:$0xff]   ;;  %v1556_v8 = vld [vmem:[#allocation5 + $0x34] ss:$12 sps:$4 sm:$0xff]  }
  0x29   :  { %1096 = vmatpush1.bf16.msra.mxu0 %v1549_v3  ;;  %1056 = vmatprep.subr.bf16.mxu1 %v1550_v4  ;;  %v1555_v7 = vld [vmem:[#allocation5 + $0x198] ss:$12 sps:$4 sm:$0xff]   ;;  %v1558_v9 = vld [vmem:[#allocation5 + $0x1b4] ss:$12 sps:$4 sm:$0xff]   ;;  %v1560_v10 = vld [vmem:[#allocation5 + $0x30] ss:$12 sps:$4 sm:$0xff]  }
  0x2a   :  { %1097 = vmatprep.subr.bf16.mxu0 %v1552_v5  ;;  %v1561_v11 = vld [vmem:[#allocation5 + $0x1b0] ss:$12 sps:$4 sm:$0xff]   ;;  %v1562_v12 = vld [vmem:[#allocation5 + $0x4c] ss:$12 sps:$4 sm:$0xff]   ;;  %v1566_v14 = vld [vmem:[#allocation5 + $0x48] ss:$12 sps:$4 sm:$0xff]  }
  0x2b   :  { %v1564_v13 = vld [vmem:[#allocation5 + $0x1cc] ss:$12 sps:$4 sm:$0xff]   ;;  %v1567_v15 = vld [vmem:[#allocation5 + $0x1c8] ss:$12 sps:$4 sm:$0xff]   ;;  %v1568_v16 = vld [vmem:[#allocation5 + $0x64] ss:$12 sps:$4 sm:$0xff]  }
  0x2c   :  { %1057 = vmatpush1.bf16.msra.mxu1 %v1554_v6  ;;  %v1570_v17 = vld [vmem:[#allocation5 + $0x1e4] ss:$12 sps:$4 sm:$0xff]   ;;  %v1572_v18 = vld [vmem:[#allocation5 + $0x60] ss:$12 sps:$4 sm:$0xff]   ;;  %v1574_v20 = vld [vmem:[#allocation5 + $0x7c] ss:$12 sps:$4 sm:$0xff]  }
  0x2d   :  { %1098 = vmatpush1.bf16.msra.mxu0 %v1555_v7  ;;  %1058 = vmatprep.subr.bf16.mxu1 %v1556_v8  ;;  %v1573_v19 = vld [vmem:[#allocation5 + $0x1e0] ss:$12 sps:$4 sm:$0xff]   ;;  %v1576_v21 = vld [vmem:[#allocation5 + $0x1fc] ss:$12 sps:$4 sm:$0xff]   ;;  %v1578_v22 = vld [vmem:[#allocation5 + $0x78] ss:$12 sps:$4 sm:$0xff]  }
  0x2e   :  { %1099 = vmatprep.subr.bf16.mxu0 %v1558_v9  ;;  %v1579_v23 = vld [vmem:[#allocation5 + $0x1f8] ss:$12 sps:$4 sm:$0xff]   ;;  %v1580_v24 = vld [vmem:[#allocation5 + $0x94] ss:$12 sps:$4 sm:$0xff]   ;;  %v1584_v26 = vld [vmem:[#allocation5 + $0x90] ss:$12 sps:$4 sm:$0xff]  }
  0x2f   :  { %v1582_v25 = vld [vmem:[#allocation5 + $0x214] ss:$12 sps:$4 sm:$0xff]   ;;  %v1585_v27 = vld [vmem:[#allocation5 + $0x210] ss:$12 sps:$4 sm:$0xff]   ;;  %v1586_v28 = vld [vmem:[#allocation5 + $0xac] ss:$12 sps:$4 sm:$0xff]  }
  0x30   :  { %1059 = vmatpush1.bf16.msra.mxu1 %v1560_v10  ;;  %v1588_v29 = vld [vmem:[#allocation5 + $0x22c] ss:$12 sps:$4 sm:$0xff]   ;;  %v1590_v30 = vld [vmem:[#allocation5 + $0xa8] ss:$12 sps:$4 sm:$0xff]   ;;  %v1592_v32 = vld [vmem:[#allocation5 + $0xc4] ss:$12 sps:$4 sm:$0xff]  }
  0x31   :  { %1100 = vmatpush1.bf16.msra.mxu0 %v1561_v11  ;;  %1060 = vmatprep.subr.bf16.mxu1 %v1562_v12  ;;  %v1591_v31 = vld [vmem:[#allocation5 + $0x228] ss:$12 sps:$4 sm:$0xff]   ;;  %v1594_v33 = vld [vmem:[#allocation5 + $0x244] ss:$12 sps:$4 sm:$0xff]   ;;  %v1596_v34 = vld [vmem:[#allocation5 + $0xc0] ss:$12 sps:$4 sm:$0xff]  }
  0x32   :  { %1101 = vmatprep.subr.bf16.mxu0 %v1564_v13  ;;  %v1597_v35 = vld [vmem:[#allocation5 + $0x240] ss:$12 sps:$4 sm:$0xff]   ;;  %v1813_v37 = vmov 1983009808   ;;  %v1598_v39 = vld [vmem:[#allocation5 + $0xdc] ss:$12 sps:$4 sm:$0xff]  }
  0x33   :  { %v257_v38 = vunpack.c.l.s4 %v1813_v37  ;;  %v1600_v40 = vld [vmem:[#allocation5 + $0x25c] ss:$12 sps:$4 sm:$0xff]   ;;  %v1602_v41 = vld [vmem:[#allocation5 + $0xd8] ss:$12 sps:$4 sm:$0xff]   ;;  %v1866_v42 = vshrl.u32 %v238_v36, 7 }
  0x34   :  { %1061 = vmatpush1.bf16.msra.mxu1 %v1566_v14  ;;  %v1603_v44 = vld [vmem:[#allocation5 + $0x258] ss:$12 sps:$4 sm:$0xff]   ;;  %v1604_v45 = vld [vmem:[#allocation5 + $0xf4] ss:$12 sps:$4 sm:$0xff]   ;;  %v1608_v47 = vld [vmem:[#allocation5 + $0xf0] ss:$12 sps:$4 sm:$0xff]  }
  0x35   :  { %1102 = vmatpush1.bf16.msra.mxu0 %v1567_v15  ;;  %1062 = vmatprep.subr.bf16.mxu1 %v1568_v16  ;;  %v258_v43 = vunpack.c.0.s8 %v257_v38  ;;  %v1606_v46 = vld [vmem:[#allocation5 + $0x274] ss:$12 sps:$4 sm:$0xff]   ;;  %v1609_v48 = vld [vmem:[#allocation5 + $0x270] ss:$12 sps:$4 sm:$0xff]   ;;  %v1610_v50 = vld [vmem:[#allocation5 + $0x10c] ss:$12 sps:$4 sm:$0xff]  }
  0x36   :  { %1103 = vmatprep.subr.bf16.mxu0 %v1570_v17  ;;  %v1612_v51 = vld [vmem:[#allocation5 + $0x28c] ss:$12 sps:$4 sm:$0xff]   ;;  %v1614_v52 = vld [vmem:[#allocation5 + $0x108] ss:$12 sps:$4 sm:$0xff]   ;;  %v1616_v57 = vld [vmem:[#allocation5 + $0x124] ss:$12 sps:$4 sm:$0xff]  }
  0x37   :  { %v261_v49 = vsub.s32 %v258_v43, %v1866_v42  ;;  %v42_v53 = vld [vmem:[#allocation2] sm:$0xff]  ;;  %v1618_v58 = vld [vmem:[#allocation5 + $0x2a4] ss:$12 sps:$4 sm:$0xff]   ;;  %v1620_v61 = vld [vmem:[#allocation5 + $0x120] ss:$12 sps:$4 sm:$0xff]  }
  0x38   :  { %1063 = vmatpush1.bf16.msra.mxu1 %v1572_v18  ;;  %v1615_v54 = vld [vmem:[#allocation5 + $0x288] ss:$12 sps:$4 sm:$0xff]   ;;  %v255_v56 = vcombine.high %v42_v53, %v42_v53  ;;  %v1621_v62 = vld [vmem:[#allocation5 + $0x2a0] ss:$12 sps:$4 sm:$0xff]   ;;  %v1626_v2 = vld [vmem:[#allocation5 + $0x138] ss:$12 sps:$4 sm:$0xff]  }
  0x39   :  { %1104 = vmatpush1.bf16.msra.mxu0 %v1573_v19  ;;  %1064 = vmatprep.subr.bf16.mxu1 %v1574_v20  ;;  %v1869_v55 = vrot.slane %v42_v53, %v261_v49  ;;  %v1622_v0 = vld [vmem:[#allocation5 + $0x13c] ss:$12 sps:$4 sm:$0xff]   ;;  %v1627_v3 = vld [vmem:[#allocation5 + $0x2b8] ss:$12 sps:$4 sm:$0xff]   ;;  %v1628_v4 = vld [vmem:[#allocation5 + $0x154] ss:$12 sps:$4 sm:$0xff]  }
  0x3a   :  { %1105 = vmatprep.subr.bf16.mxu0 %v1576_v21  ;;  %v1873_v60 = vrot.slane %v255_v56, %v261_v49  ;;  %v1624_v1 = vld [vmem:[#allocation5 + $0x2bc] ss:$12 sps:$4 sm:$0xff]   ;;  %v1630_v5 = vld [vmem:[#allocation5 + $0x2d4] ss:$12 sps:$4 sm:$0xff]   ;;  %v1634_v8 = vld [vmem:[#allocation5 + $0x16c] ss:$12 sps:$4 sm:$0xff]  }
  0x3b   :  { %v270_v59 = vcombine.high %v1869_v55, %v1869_v55  ;;  %v1632_v6 = vld [vmem:[#allocation5 + $0x150] ss:$12 sps:$4 sm:$0xff]   ;;  %v1636_v9 = vld [vmem:[#allocation5 + $0x2ec] ss:$12 sps:$4 sm:$0xff]   ;;  %v1638_v10 = vld [vmem:[#allocation5 + $0x168] ss:$12 sps:$4 sm:$0xff]  }
  0x3c   :  { %1065 = vmatpush1.bf16.msra.mxu1 %v1578_v22  ;;  %v1877_v63 = vcombine.high %v1873_v60, %v1873_v60  ;;  %v1633_v7 = vld [vmem:[#allocation5 + $0x2d0] ss:$12 sps:$4 sm:$0xff]   ;;  %v1639_v11 = vld [vmem:[#allocation5 + $0x2e8] ss:$12 sps:$4 sm:$0xff]   ;;  %v1641_v14 = vld [vmem:[#allocation5 + $0x300] ss:$12 sps:$4 sm:$0xff]  }
  0x3d   :  { %1106 = vmatpush1.bf16.msra.mxu0 %v1579_v23  ;;  %1066 = vmatprep.subr.bf16.mxu1 %v1580_v24  ;;  %v1643_v12 = vld [vmem:[#allocation5 + $0x304] ss:$12 sps:$4 sm:$0xff]   ;;  %v1644_v13 = vld [vmem:[#allocation5 + $0xc8] ss:$12 sps:$4 sm:$0xff]   ;;  %v1649_v17 = vld [vmem:[#allocation5 + $0xe0] ss:$12 sps:$4 sm:$0xff]  }
  0x3e   :  { %1107 = vmatprep.subr.bf16.mxu0 %v1582_v25  ;;  %1086 = vmatprep.mubr.bf16.mxu1 %v270_v59  ;;  %v1645_v15 = vld [vmem:[#allocation5 + $0x8] ss:$12 sps:$4 sm:$0xff]   ;;  %v1646_v18 = vld [vmem:[#allocation5 + $0x318] ss:$12 sps:$4 sm:$0xff]   ;;  %v1650_v19 = vld [vmem:[#allocation5 + $0x20] ss:$12 sps:$4 sm:$0xff]  }
  0x3f   :  { %1127 = vmatprep.mubr.bf16.mxu0 %v1877_v63  ;;  %v1648_v16 = vld [vmem:[#allocation5 + $0x31c] ss:$12 sps:$4 sm:$0xff]   ;;  %v1653_v20 = vld [vmem:[#allocation5 + $0x334] ss:$12 sps:$4 sm:$0xff]   ;;  %v1654_v21 = vld [vmem:[#allocation5 + $0xf8] ss:$12 sps:$4 sm:$0xff]  }
  0x40   :  { %1067 = vmatpush1.bf16.msra.mxu1 %v1584_v26  ;;  %v1651_v22 = vld [vmem:[#allocation5 + $0x330] ss:$12 sps:$4 sm:$0xff]   ;;  %v1655_v23 = vld [vmem:[#allocation5 + $0x38] ss:$12 sps:$4 sm:$0xff]   ;;  %v1656_v26 = vld [vmem:[#allocation5 + $0x348] ss:$12 sps:$4 sm:$0xff]  }
  0x41   :  { %1108 = vmatpush1.bf16.msra.mxu0 %v1585_v27  ;;  %1068 = vmatprep.subr.bf16.mxu1 %v1586_v28  ;;  %v1658_v24 = vld [vmem:[#allocation5 + $0x34c] ss:$12 sps:$4 sm:$0xff]   ;;  %v1659_v25 = vld [vmem:[#allocation5 + $0x110] ss:$12 sps:$4 sm:$0xff]   ;;  %v1673_v36 = vld [vmem:[#allocation5 + $0x394] ss:$12 sps:$4 sm:$0xff]  }
  0x42   :  { %1109 = vmatprep.subr.bf16.mxu0 %v1588_v29  ;;  %v1660_v27 = vld [vmem:[#allocation5 + $0x50] ss:$12 sps:$4 sm:$0xff]   ;;  %v1664_v29 = vld [vmem:[#allocation5 + $0x128] ss:$12 sps:$4 sm:$0xff]   ;;  %v1674_v37 = vld [vmem:[#allocation5 + $0x158] ss:$12 sps:$4 sm:$0xff]  }
  0x43   :  { %v1663_v28 = vld [vmem:[#allocation5 + $0x364] ss:$12 sps:$4 sm:$0xff]   ;;  %v1676_v43 = vld [vmem:[#allocation5 + $0x3a8] ss:$12 sps:$4 sm:$0xff]  }
  0x44   :  { %1069 = vmatpush1.bf16.msra.mxu1 %v1590_v30  ;;  %v1661_v30 = vld [vmem:[#allocation5 + $0x360] ss:$12 sps:$4 sm:$0xff]   ;;  %v1671_v38 = vld [vmem:[#allocation5 + $0x390] ss:$12 sps:$4 sm:$0xff]   ;;  %v1686_v53 = vld [vmem:[#allocation5 + $0x3d8] ss:$12 sps:$4 sm:$0xff]  }
  0x45   :  { %1110 = vmatpush1.bf16.msra.mxu0 %v1591_v31  ;;  %1070 = vmatprep.subr.bf16.mxu1 %v1592_v32  ;;  %v1665_v31 = vld [vmem:[#allocation5 + $0x68] ss:$12 sps:$4 sm:$0xff]  }
  0x46   :  { %1111 = vmatprep.subr.bf16.mxu0 %v1594_v33  ;;  %v1668_v32 = vld [vmem:[#allocation5 + $0x37c] ss:$12 sps:$4 sm:$0xff]   ;;  %v1669_v33 = vld [vmem:[#allocation5 + $0x140] ss:$12 sps:$4 sm:$0xff]  }
  0x47   :  { %v1688_v49 = vld [vmem:[#allocation5 + $0x3dc] ss:$12 sps:$4 sm:$0xff]   ;;  %v1693_v56 = vld [vmem:[#allocation5 + $0x3f4] ss:$12 sps:$4 sm:$0xff]  }
  0x48   :  { %1071 = vmatpush1.bf16.msra.mxu1 %v1596_v34  ;;  %v1666_v34 = vld [vmem:[#allocation5 + $0x378] ss:$12 sps:$4 sm:$0xff]  }
  0x49   :  { %1112 = vmatpush1.bf16.msra.mxu0 %v1597_v35  ;;  %1072 = vmatprep.subr.bf16.mxu1 %v1598_v39  ;;  %v1670_v35 = vld [vmem:[#allocation5 + $0x80] ss:$12 sps:$4 sm:$0xff]   ;;  %v1675_v39 = vld [vmem:[#allocation5 + $0x98] ss:$12 sps:$4 sm:$0xff]  }
  0x4a   :  { %1113 = vmatprep.subr.bf16.mxu0 %v1600_v40  ;;  %v1678_v40 = vld [vmem:[#allocation5 + $0x3ac] ss:$12 sps:$4 sm:$0xff]  }
  0x4c   :  { %1073 = vmatpush1.bf16.msra.mxu1 %v1602_v41  ;;  %v1679_v41 = vld [vmem:[#allocation5 + $0x170] ss:$12 sps:$4 sm:$0xff]  }
  0x4d   :  { %1114 = vmatpush1.bf16.msra.mxu0 %v1603_v44  ;;  %1074 = vmatprep.subr.bf16.mxu1 %v1604_v45  ;;  %v1680_v44 = vld [vmem:[#allocation5 + $0xb0] ss:$12 sps:$4 sm:$0xff]  }
  0x4e   :  { %1115 = vmatprep.subr.bf16.mxu0 %v1606_v46  ;;  %v1683_v45 = vld [vmem:[#allocation5 + $0x3c4] ss:$12 sps:$4 sm:$0xff]   ;;  %v1684_v46 = vld [vmem:[#allocation5 + $0x248] ss:$12 sps:$4 sm:$0xff]  }
  0x50   :  { %1075 = vmatpush1.bf16.msra.mxu1 %v1608_v47  ;;  %v1681_v47 = vld [vmem:[#allocation5 + $0x3c0] ss:$12 sps:$4 sm:$0xff]  }
  0x51   :  { %1116 = vmatpush1.bf16.msra.mxu0 %v1609_v48  ;;  %1076 = vmatprep.subr.bf16.mxu1 %v1610_v50  ;;  %v1685_v48 = vld [vmem:[#allocation5 + $0x188] ss:$12 sps:$4 sm:$0xff]   ;;  %v1882_v50 = vld.sshfl [vmem:[#allocation2 + $0x8] sm:$0x33 pattern:$0x76325410] }
  0x52   :  { %1117 = vmatprep.subr.bf16.mxu0 %v1612_v51  ;;  %v1689_v51 = vld [vmem:[#allocation5 + $0x260] ss:$12 sps:$4 sm:$0xff]  }
  0x54   :  { %1077 = vmatpush1.bf16.msra.mxu1 %v1614_v52  ;;  %v1886_v52 = vcombine.high %v1882_v50, %v1882_v50 }
  0x55   :  { %1118 = vmatpush1.bf16.msra.mxu0 %v1615_v54  ;;  %1078 = vmatprep.subr.bf16.mxu1 %v1616_v57  ;;  %v1690_v54 = vld [vmem:[#allocation5 + $0x1a0] ss:$12 sps:$4 sm:$0xff]   ;;  %v1694_v57 = vld [vmem:[#allocation5 + $0x278] ss:$12 sps:$4 sm:$0xff]  }
  0x56   :  { %1119 = vmatprep.subr.bf16.mxu0 %v1618_v58  ;;  %v1691_v58 = vld [vmem:[#allocation5 + $0x3f0] ss:$12 sps:$4 sm:$0xff]  }
  0x58   :  { %1079 = vmatpush1.bf16.msra.mxu1 %v1620_v61  ;;  %v1698_v61 = vld [vmem:[#allocation5 + $0x40c] ss:$12 sps:$4 sm:$0xff]  }
  0x59   :  { %1120 = vmatpush1.bf16.msra.mxu0 %v1621_v62  ;;  %1080 = vmatprep.subr.bf16.mxu1 %v1622_v0  ;;  %v1699_v62 = vld [vmem:[#allocation5 + $0x290] ss:$12 sps:$4 sm:$0xff]  }
  0x5a   :  { %1121 = vmatprep.subr.bf16.mxu0 %v1624_v1  ;;  %v1700_v0 = vld [vmem:[#allocation5 + $0x1d0] ss:$12 sps:$4 sm:$0xff]  }
  0x5b   :  { %v1703_v1 = vld [vmem:[#allocation5 + $0x424] ss:$12 sps:$4 sm:$0xff]  }
  0x5c   :  { %1081 = vmatpush1.bf16.msra.mxu1 %v1626_v2  ;;  %v1704_v2 = vld [vmem:[#allocation5 + $0x2a8] ss:$12 sps:$4 sm:$0xff]  }
  0x5d   :  { %1122 = vmatpush1.bf16.msra.mxu0 %v1627_v3  ;;  %1082 = vmatprep.subr.bf16.mxu1 %v1628_v4  ;;  %v1701_v3 = vld [vmem:[#allocation5 + $0x420] ss:$12 sps:$4 sm:$0xff]   ;;  %v1705_v4 = vld [vmem:[#allocation5 + $0x1e8] ss:$12 sps:$4 sm:$0xff]  }
  0x5e   :  { %1123 = vmatprep.subr.bf16.mxu0 %v1630_v5  ;;  %v1709_v5 = vld [vmem:[#allocation5 + $0x2c0] ss:$12 sps:$4 sm:$0xff]  }
  0x60   :  { %1083 = vmatpush1.bf16.msra.mxu1 %v1632_v6  ;;  %v1706_v6 = vld [vmem:[#allocation5 + $0x438] ss:$12 sps:$4 sm:$0xff]  }
  0x61   :  { %1124 = vmatpush1.bf16.msra.mxu0 %v1633_v7  ;;  %1084 = vmatprep.subr.bf16.mxu1 %v1634_v8  ;;  %v1710_v7 = vld [vmem:[#allocation5 + $0x200] ss:$12 sps:$4 sm:$0xff]  }
  0x62   :  { %1125 = vmatprep.subr.bf16.mxu0 %v1636_v9  ;;  %v1713_v8 = vld [vmem:[#allocation5 + $0x454] ss:$12 sps:$4 sm:$0xff]   ;;  %v1714_v9 = vld [vmem:[#allocation5 + $0x2d8] ss:$12 sps:$4 sm:$0xff]  }
  0x64   :  { %1085 = vmatpush1.bf16.msra.mxu1 %v1638_v10  ;;  %v1711_v10 = vld [vmem:[#allocation5 + $0x450] ss:$12 sps:$4 sm:$0xff]  }
  0x65   :  { %1126 = vmatpush1.bf16.msra.mxu0 %v1639_v11  ;;  %1464 = vmatprep.subr.bf16.mxu1 %v1644_v13  ;;  %v1715_v11 = vld [vmem:[#allocation5 + $0x218] ss:$12 sps:$4 sm:$0xff]   ;;  %v1719_v13 = vld [vmem:[#allocation5 + $0x2f0] ss:$12 sps:$4 sm:$0xff]  }
  0x66   :  { %1136 = vmatprep.subr.bf16.mxu0 %v1643_v12  ;;  %v1718_v12 = vld [vmem:[#allocation5 + $0x46c] ss:$12 sps:$4 sm:$0xff]  }
  0x67   :  { %1087 = vmatmul.mubr.bf16.vlgmr.msra.gmra.mrb[0].mxu1 %v1869_v55 }
  0x68   :  { %1128 = vmatmul.mubr.bf16.vlgmr.msra.gmra.mrb[0].mxu0 %v1873_v60  ;;  %1465 = vmatpush3.bf16.msra.mxu1 %v1645_v15  ;;  %v1720_v15 = vld [vmem:[#allocation5 + $0x230] ss:$12 sps:$4 sm:$0xff]  }
  0x69   :  { %1137 = vmatpush1.bf16.msra.mxu0 %v1641_v14  ;;  %1466 = vmatprep.subr.bf16.mxu1 %v1649_v17  ;;  %v1716_v14 = vld [vmem:[#allocation5 + $0x468] ss:$12 sps:$4 sm:$0xff]  }
  0x6a   :  { %1138 = vmatprep.subr.bf16.mxu0 %v1648_v16  ;;  %1209 = vmatprep.mubr.bf16.mxu1 %v270_v59  ;;  %v1695_v59 = vld [vmem:[#allocation5 + $0x1b8] ss:$12 sps:$4 sm:$0xff]   ;;  %v1721_v16 = vld [vmem:[#allocation5 + $0x3c8] ss:$12 sps:$4 sm:$0xff]  }
  0x6b   :  { %1168 = vmatprep.mubr.bf16.mxu0 %v1886_v52  ;;  %v1722_v17 = vld [vmem:[#allocation5 + $0x308] ss:$12 sps:$4 sm:$0xff]  }
  0x6c   :  { %1467 = vmatpush3.bf16.msra.mxu1 %v1650_v19  ;;  %v1724_v19 = vld [vmem:[#allocation5 + $0x320] ss:$12 sps:$4 sm:$0xff]  }
  0x6d   :  { %1139 = vmatpush1.bf16.msra.mxu0 %v1646_v18  ;;  %1468 = vmatprep.subr.bf16.mxu1 %v1654_v21  ;;  %v1723_v18 = vld [vmem:[#allocation5 + $0x3e0] ss:$12 sps:$4 sm:$0xff]   ;;  %v1726_v21 = vld [vmem:[#allocation5 + $0x338] ss:$12 sps:$4 sm:$0xff]  }
  0x6e   :  { %1140 = vmatprep.subr.bf16.mxu0 %v1653_v20  ;;  %v1725_v20 = vld [vmem:[#allocation5 + $0x3f8] ss:$12 sps:$4 sm:$0xff]  }
  0x70   :  { %1469 = vmatpush3.bf16.msra.mxu1 %v1655_v23  ;;  %v1728_v23 = vld [vmem:[#allocation5 + $0x350] ss:$12 sps:$4 sm:$0xff]  }
  0x71   :  { %1141 = vmatpush1.bf16.msra.mxu0 %v1651_v22  ;;  %1470 = vmatprep.subr.bf16.mxu1 %v1659_v25  ;;  %v1727_v22 = vld [vmem:[#allocation5 + $0x410] ss:$12 sps:$4 sm:$0xff]   ;;  %v1730_v25 = vld [vmem:[#allocation5 + $0x368] ss:$12 sps:$4 sm:$0xff]  }
  0x72   :  { %1142 = vmatprep.subr.bf16.mxu0 %v1658_v24  ;;  %v1729_v24 = vld [vmem:[#allocation5 + $0x428] ss:$12 sps:$4 sm:$0xff]  }
  0x74   :  { %1471 = vmatpush3.bf16.msra.mxu1 %v1660_v27  ;;  %v1733_v27 = vld [vmem:[#allocation5 + $0x458] ss:$12 sps:$4 sm:$0xff]  }
  0x75   :  { %1143 = vmatpush1.bf16.msra.mxu0 %v1656_v26  ;;  %1472 = vmatprep.subr.bf16.mxu1 %v1664_v29  ;;  %v1731_v26 = vld [vmem:[#allocation5 + $0x440] ss:$12 sps:$4 sm:$0xff]   ;;  %v1735_v29 = vld [vmem:[#allocation5 + $0x470] ss:$12 sps:$4 sm:$0xff]  }
  0x76   :  { %1144 = vmatprep.subr.bf16.mxu0 %v1663_v28  ;;  %v1734_v28 = vld [vmem:[#allocation5 + $0x398] ss:$12 sps:$4 sm:$0xff]  }
  0x78   :  { %1473 = vmatpush3.bf16.msra.mxu1 %v1665_v31 }
  0x79   :  { %1145 = vmatpush1.bf16.msra.mxu0 %v1661_v30  ;;  %1474 = vmatprep.subr.bf16.mxu1 %v1669_v33  ;;  %v1736_v30 = vld [vmem:[#allocation5 + $0x3b0] ss:$12 sps:$4 sm:$0xff]  }
  0x7a   :  { %1146 = vmatprep.subr.bf16.mxu0 %v1668_v32 }
  0x7c   :  { %1475 = vmatpush3.bf16.msra.mxu1 %v1670_v35 }
  0x7d   :  { %1147 = vmatpush1.bf16.msra.mxu0 %v1666_v34  ;;  %1476 = vmatprep.subr.bf16.mxu1 %v1674_v37 }
  0x7e   :  { %1148 = vmatprep.subr.bf16.mxu0 %v1673_v36 }
  0x80   :  { %1477 = vmatpush3.bf16.msra.mxu1 %v1675_v39 }
  0x81   :  { %1149 = vmatpush1.bf16.msra.mxu0 %v1671_v38  ;;  %1478 = vmatprep.subr.bf16.mxu1 %v1679_v41  ;;  %v236_v41 = vld [vmem:[%s1915_s2] sm:$0x7]  ;;  %s1814_s2 = smov [#allocation7]  }
  0x82   :  { %1150 = vmatprep.subr.bf16.mxu0 %v1678_v40  ;;  %v240_v40 = vsub.s32 0, %v1866_v42  ;;  %s1309_s11 = sshll.u32 %s1814_s2, 4  ;;  %s1310_s11 = int_to_ptr.vmem [resolvable:$true] %s1309_s11 }
  0x83   :  { %s1781_s12 = scalar_lea.vmem %s1310_s11, 192  ;;  %p1786_p3 = scmp.lt.s32.totalorder %s1310_s11, %s1310_s11 }
  0x84   :  { %1479 = vmatpush3.bf16.msra.mxu1 %v1680_v44  ;;  %v248_v44 = vsub.s32 2, %v1866_v42  ;;  %p1782_p2 = scmp.ne.s32.totalorder %s1310_s11, %s1781_s12  ;;  %p1787_p4 = scmp.lt.s32.totalorder %s1781_s12, %s1781_s12 }
  0x85   :  { %1151 = vmatpush1.bf16.msra.mxu0 %v1676_v43  ;;  %1486 = vmatprep.subr.bf16.mxu1 %v1684_v46  ;;  %v244_v43 = vsub.s32 1, %v1866_v42 }
  0x86   :  { %1152 = vmatprep.subr.bf16.mxu0 %v1683_v45  ;;  %v241_v45 = vrot.slane %v236_v41, %v240_v40  ;;  %p1788_p5 = por %p1787_p4, %p1786_p3 }
  0x87   :  { %1210 = vmatmul.mubr.bf16.vlgmr.msra.gmra.mrb[4].mxu1 %v1869_v55  ;;  %v1696_v55 = vld [vmem:[#allocation5 + $0x408] ss:$12 sps:$4 sm:$0xff]   ;;  %v245_v46 = vrot.slane %v236_v41, %v244_v43 }
  0x88   :  { %1487 = vmatpush3.bf16.msra.mxu1 %v1685_v48  ;;  %1249 = vmatprep.mubr.bf16.mxu1 %v1877_v63  ;;  %v1708_v63 = vld [vmem:[#allocation5 + $0x43c] ss:$12 sps:$4 sm:$0xff]   ;;  %p1789_p6 = pnand %p1788_p5, %p1782_p2 }
  0x89   :  { %1153 = vmatpush1.bf16.msra.mxu0 %v1681_v47  ;;  %1488 = vmatprep.subr.bf16.mxu1 %v1689_v51  ;;  %v249_v47 = vrot.slane %v236_v41, %v248_v44 }
  0x8a   :  { %1154 = vmatprep.subr.bf16.mxu0 %v1688_v49 }
  0x8c   :  { %1489 = vmatpush3.bf16.msra.mxu1 %v1690_v54 }
  0x8d   :  { %1155 = vmatpush1.bf16.msra.mxu0 %v1686_v53  ;;  %1490 = vmatprep.subr.bf16.mxu1 %v1694_v57 }
  0x8e   :  { %1156 = vmatprep.subr.bf16.mxu0 %v1693_v56 }
  0x90   :  { %1491 = vmatpush3.bf16.msra.mxu1 %v1695_v59 }
  0x91   :  { %1157 = vmatpush1.bf16.msra.mxu0 %v1691_v58  ;;  %1492 = vmatprep.subr.bf16.mxu1 %v1699_v62 }
  0x92   :  { %1158 = vmatprep.subr.bf16.mxu0 %v1698_v61 }
  0x94   :  { %1493 = vmatpush3.bf16.msra.mxu1 %v1700_v0 }
  0x95   :  { %1159 = vmatpush1.bf16.msra.mxu0 %v1696_v55  ;;  %1494 = vmatprep.subr.bf16.mxu1 %v1704_v2 }
  0x96   :  { %1160 = vmatprep.subr.bf16.mxu0 %v1703_v1 }
  0x98   :  { %1495 = vmatpush3.bf16.msra.mxu1 %v1705_v4 }
  0x99   :  { %1161 = vmatpush1.bf16.msra.mxu0 %v1701_v3  ;;  %1496 = vmatprep.subr.bf16.mxu1 %v1709_v5 }
  0x9a   :  { %1162 = vmatprep.subr.bf16.mxu0 %v1708_v63 }
  0x9c   :  { %1497 = vmatpush3.bf16.msra.mxu1 %v1710_v7 }
  0x9d   :  { %1163 = vmatpush1.bf16.msra.mxu0 %v1706_v6  ;;  %1498 = vmatprep.subr.bf16.mxu1 %v1714_v9 }
  0x9e   :  { %1164 = vmatprep.subr.bf16.mxu0 %v1713_v8 }
  0xa0   :  { %1499 = vmatpush3.bf16.msra.mxu1 %v1715_v11 }
  0xa1   :  { %1165 = vmatpush1.bf16.msra.mxu0 %v1711_v10  ;;  %1500 = vmatprep.subr.bf16.mxu1 %v1719_v13 }
  0xa2   :  { %1166 = vmatprep.subr.bf16.mxu0 %v1718_v12 }
  0xa4   :  { %1501 = vmatpush3.bf16.msra.mxu1 %v1720_v15 }
  0xa5   :  { %1167 = vmatpush1.bf16.msra.mxu0 %v1716_v14  ;;  %1508 = vmatprep.subr.bf16.mxu1 %v1721_v16 }
  0xa7   :  { %1250 = vmatmul.mubr.bf16.vlgmr.msra.gmra.mrb[8].mxu1 %v1873_v60  ;;  %v1732_v60 = vld [vmem:[#allocation5 + $0x380] ss:$12 sps:$4 sm:$0xff]  }
  0xa8   :  { %1169 = vmatmul.mubr.bf16.vlgmr.msra.gmra.mrb[0].mxu0 %v1882_v50  ;;  %1509 = vmatpush3.bf16.msra.mxu1 %v1722_v17 }
  0xa9   :  { %1289 = vmatprep.mubr.bf16.mxu1 %v1886_v52  ;;  %1510 = vmatprep.subr.bf16.mxu1 %v1723_v18 }
  0xac   :  { %1511 = vmatpush3.bf16.msra.mxu1 %v1724_v19 }
  0xad   :  { %1512 = vmatprep.subr.bf16.mxu1 %v1725_v20 }
  0xb0   :  { %1513 = vmatpush3.bf16.msra.mxu1 %v1726_v21 }
  0xb1   :  { %1514 = vmatprep.subr.bf16.mxu1 %v1727_v22 }
  0xb4   :  { %1515 = vmatpush3.bf16.msra.mxu1 %v1728_v23 }
  0xb5   :  { %1516 = vmatprep.subr.bf16.mxu1 %v1729_v24 }
  0xb8   :  { %1517 = vmatpush3.bf16.msra.mxu1 %v1730_v25 }
  0xb9   :  { %1518 = vmatprep.subr.bf16.mxu1 %v1731_v26 }
  0xbc   :  { %1519 = vmatpush3.bf16.msra.mxu1 %v1732_v60 }
  0xbd   :  { %1520 = vmatprep.subr.bf16.mxu1 %v1733_v27 }
  0xc0   :  { %1521 = vmatpush3.bf16.msra.mxu1 %v1734_v28 }
  0xc1   :  { %1522 = vmatprep.subr.bf16.mxu1 %v1735_v29 }
  0xc4   :  { %1523 = vmatpush3.bf16.msra.mxu1 %v1736_v30 }
  0xc7   :  { %1290 = vmatmul.mubr.bf16.vlgmr.msra.gmra.mrb[12].mxu1 %v1882_v50 }
 0x13a   :  { %v1088_v31 = vpop.f32.mrb[0].mxu1 }
 0x13b   :  { %v1090_v32 = vpop.f32.mrb[1].mxu1  ;;  %v1089_v48 = vadd.f32 %v1088_v31, %v241_v45 }
 0x13c   :  { %v1092_v33 = vpop.f32.mrb[2].mxu1  ;;  %v1091_v49 = vadd.f32 %v1090_v32, %v245_v46 }
 0x13d   :  { %v1093_v34 = vpop.f32.mrb[3].mxu1 }
 0x15a   :  { %v1480_v35 = vpop.f32.mrb[4].mxu1 }
 0x15b   :  { %v1481_v36 = vpop.f32.mrb[5].mxu1 }
 0x15c   :  { %v1482_v37 = vadd.f32 %v1481_v36, %v1480_v35  ;;  %v1483_v38 = vpop.f32.mrb[6].mxu1 }
 0x15d   :  { %v1484_v39 = vpop.f32.mrb[7].mxu1 }
 0x15e   :  { %v1212_v56 = vadd.f32 %v1482_v37, %v249_v47 }
 0x17a   :  { %v1502_v51 = vpop.f32.mrb[8].mxu1 }
 0x17b   :  { %v1170_v50 = vpop.f32.mrb[0].mxu0  ;;  %v1503_v54 = vpop.f32.mrb[9].mxu1 }
 0x17c   :  { %v1531_v52 = vadd.f32 %v1170_v50, %v1089_v48  ;;  %v1172_v53 = vpop.f32.mrb[1].mxu0  ;;  %v1504_v58 = vadd.f32 %v1503_v54, %v1502_v51  ;;  %v1505_v61 = vpop.f32.mrb[10].mxu1 }
 0x17d   :  { %v1533_v57 = vadd.f32 %v1172_v53, %v1091_v49  ;;  %v1174_v59 = vpop.f32.mrb[2].mxu0  ;;  %v1506_v55 = vpop.f32.mrb[11].mxu1 }
 0x17e   :  { %v1175_v62 = vpop.f32.mrb[3].mxu0  ;;  %v1252_v1 = vadd.f32 %v1504_v58, %v1212_v56 }
 0x17f   :  { %v1299_v0 = vcombine.low %v1531_v52, %v1533_v57 }
 0x181   :  { %1301 = vst [vmem:[#allocation7] sm:$0xff] %v1299_v0 }
 0x19a   :  { %v1524_v42 = vpop.f32.mrb[12].mxu1 }
 0x19b   :  { %v1525_v2 = vpop.f32.mrb[13].mxu1 }
 0x19c   :  { %v1526_v3 = vadd.f32 %v1525_v2, %v1524_v42  ;;  %v1527_v4 = vpop.f32.mrb[14].mxu1 }
 0x19d   :  { %v1528_v63 = vpop.f32.mrb[15].mxu1 }
 0x19e   :  { %v1292_v5 = vadd.f32 %v1526_v3, %v1252_v1 }
 0x1a0   :  { %1302 = vst [vmem:[#allocation7 + $0x8] sm:$0xf] %v1292_v5 }
 0x1a1   :  { %1792 = shalt.err (!%p1789_p6)
}
 0x1a2   :  { %s1793_s15 = scalar_lea.hbm %s1916_s3, 192 }
 0x1a3   :  { %p1794_p7 = scmp.ne.s32.totalorder %s1916_s3, %s1793_s15  ;;  %p1797_p8 = scmp.lt.u32.totalorder %s1793_s15, %s1916_s3 }
 0x1a5   :  { %p1799_p9 = pnand %p1797_p8, %p1794_p7 }
 0x1a7   :  { %1802 = shalt.err (!%p1799_p9)
}
 0x1a8   :  { %1312 = dma.vmem_to_hbm [thread:$0]  %s1310_s11, 192, %s1916_s3, [#allocation4]  }
 0x1a9   :  { %1807 = dma.done.wait [#allocation4], 192  }
 0x1aa   :  { %1808 = vsyncadd [#allocation4], 4294967104 }
 0x1ab   :  { %1316 = vsyncpa [#allocation3], 1 }
 0x1ac   :  { %1317 = vsyncpa [#allocation6], 1 }
 0x1ad   :  { %1318 = vsyncpa [#allocation4], 1 }

</bundles_post_ra>
